<compile_context>
chip_gen: v5e
topology: v5e:2x2
jax: 0.10.0
libtpu: 0.0.40
codegen_flags: <defaults>
</compile_context>

<pallas_src>
import jax
import jax.numpy as jnp
from jax.experimental import pallas as pl
from jax.experimental.pallas import tpu as pltpu


def _round_up(a: int, b: int) -> int:
    return ((a + b - 1) // b) * b


def _full3net_kernel(x_ref, w1_ref, b1_ref, w2_ref, b2_ref, w3_ref, b3_ref,
                     out_ref):
    # x block: (2, T) -- batch on the lane axis.
    x = x_ref[...]
    x0 = x[0:1, :]                         # (1, T)  feature 0
    x1 = x[1:2, :]                         # (1, T)  feature 1

    w1 = w1_ref[...]                       # (hid, 2)
    w1a = w1[:, 0:1]                       # (hid, 1)
    w1b = w1[:, 1:2]                       # (hid, 1)

    # layer 1: Linear(2, hid) + tanh  -- K=2 contraction done on the VPU
    # (two broadcast mul-adds) instead of a 98%-padded MXU matmul.
    h1 = jnp.tanh(w1a * x0 + w1b * x1 + b1_ref[...])          # (hid, T)

    # layer 2: Linear(hid, hid) + tanh -- the only real matmul, on the MXU.
    h2 = jnp.tanh(
        jnp.dot(w2_ref[...], h1, preferred_element_type=jnp.float32)
        + b2_ref[...])                                          # (hid, T)

    # output layer: Linear(hid, 1) + sigmoid -- VPU multiply + XLU sublane
    # reduce; avoids a 1-column MXU matmul and keeps the result lane-dense.
    k = jnp.sum(w3_ref[...] * h2, axis=0, keepdims=True) + b3_ref[...]  # (1, T)
    out_ref[...] = jax.nn.sigmoid(k)


def full3net_forward(x, params, *, tile_n=1024):
    """x: (N, 2). params: dict in PyTorch nn.Linear layout. Returns (N, 1)."""
    n = x.shape[0]
    hid = params["w1"].shape[0]

    # Batch tile: large (default 1024) for pipelining efficiency, multiple of
    # 256 lanes; pad N up to a whole number of tiles.
    tile = min(tile_n, _round_up(max(n, 1), 256))
    n_pad = _round_up(n, tile)

    # Present the input transposed (features on sublanes, batch on lanes).
    x_t = jnp.pad(x.astype(jnp.float32).T, ((0, 0), (0, n_pad - n)))   # (2, n_pad)

    # Kernel-friendly views of the parameters (all tiny, kept VMEM-resident).
    w1 = params["w1"].astype(jnp.float32)                 # (hid, 2)
    b1 = params["b1"].astype(jnp.float32).reshape(hid, 1)
    w2 = params["w2"].astype(jnp.float32)                 # (hid, hid)
    b2 = params["b2"].astype(jnp.float32).reshape(hid, 1)
    w3 = params["w3"].astype(jnp.float32).reshape(hid, 1)
    b3 = params["b3"].astype(jnp.float32).reshape(1, 1)

    const = lambda i: (0, 0)   # weights/biases: same block every grid step
    out = pl.pallas_call(
        _full3net_kernel,
        out_shape=jax.ShapeDtypeStruct((1, n_pad), jnp.float32),
        grid=(n_pad // tile,),
        in_specs=[
            pl.BlockSpec((2, tile), lambda i: (0, i)),    # x (batch on lanes)
            pl.BlockSpec((hid, 2), const),                # w1
            pl.BlockSpec((hid, 1), const),                # b1
            pl.BlockSpec((hid, hid), const),              # w2
            pl.BlockSpec((hid, 1), const),                # b2
            pl.BlockSpec((hid, 1), const),                # w3 (as column)
            pl.BlockSpec((1, 1), const),                  # b3
        ],
        out_specs=pl.BlockSpec((1, tile), lambda i: (0, i)),
        compiler_params=pltpu.CompilerParams(
            dimension_semantics=("parallel",)),           # megacore on v7x
    )(x_t, w1, b1, w2, b2, w3, b3)

    return out[0, :n].reshape(n, 1)


def init_full3net_params(key, hid):
    """Deterministic init, mirrors torch.nn.Linear shapes exactly."""
    ks = jax.random.split(key, 6)

    def uniform(k, shape, fan_in):
        bound = 1.0 / jnp.sqrt(fan_in)
        return jax.random.uniform(k, shape, jnp.float32, -bound, bound)

    return {
        "w1": uniform(ks[0], (hid, 2), 2.0),          # nn.Linear(2, hid).weight
        "b1": uniform(ks[1], (hid,), 2.0),
        "w2": uniform(ks[2], (hid, hid), float(hid)), # nn.Linear(hid, hid)
        "b2": uniform(ks[3], (hid,), float(hid)),
        "w3": uniform(ks[4], (1, hid), float(hid)),   # nn.Linear(hid, 1).weight
        "b3": uniform(ks[5], (1,), float(hid)),
    }


def full3net_ref(x, p):
    """Pure-JAX reference with the exact PyTorch formulation (x @ W.T + b)."""
    h1 = jnp.tanh(x @ p["w1"].T + p["b1"])
    h2 = jnp.tanh(h1 @ p["w2"].T + p["b2"])
    return jax.nn.sigmoid(h2 @ p["w3"].T + p["b3"])


if __name__ == "__main__":
    key = jax.random.PRNGKey(0)
    kx, kp, kx2 = jax.random.split(key, 3)

    hid = 32
    params = init_full3net_params(kp, hid)

    # Small demo batch (ragged vs. the lane tile -> exercises padding path).
    x_small = jax.random.normal(kx, (8, 2), dtype=jnp.float32)
    out_small = jax.block_until_ready(full3net_forward(x_small, params))
    ref_small = full3net_ref(x_small, params)
    assert out_small.shape == (8, 1)
    assert jnp.allclose(out_small, ref_small, atol=2e-5, rtol=2e-5)

    # Larger batch spanning several grid steps + a ragged tail.
    x_big = jax.random.normal(kx2, (2500, 2), dtype=jnp.float32)
    out_big = jax.block_until_ready(full3net_forward(x_big, params, tile_n=1024))
    ref_big = full3net_ref(x_big, params)
    assert out_big.shape == (2500, 1)
    assert jnp.allclose(out_big, ref_big, atol=2e-5, rtol=2e-5)

    print("KERNEL_OK")
</pallas_src>

<mosaic_0001>
module attributes {stable_mosaic.version = 11 : i64} {
  func.func @_full3net_kernel(%arg0: i32, %arg1: memref<2x256xf32, #tpu.memory_space<vmem>>, %arg2: memref<32x2xf32, #tpu.memory_space<vmem>>, %arg3: memref<32x1xf32, #tpu.memory_space<vmem>>, %arg4: memref<32x32xf32, #tpu.memory_space<vmem>>, %arg5: memref<32x1xf32, #tpu.memory_space<vmem>>, %arg6: memref<32x1xf32, #tpu.memory_space<vmem>>, %arg7: memref<1x1xf32, #tpu.memory_space<vmem>>, %arg8: memref<1x256xf32, #tpu.memory_space<vmem>>) attributes {dimension_semantics = [#tpu.dimension_semantics<parallel>], iteration_bounds = array<i64: 1>, scalar_prefetch = 0 : i64, scratch_operands = 0 : i64, tpu.core_type = #tpu.core_type<tc>, window_params = [{transform_indices = @transform_0, window_bounds = array<i64: 2, 256>}, {pipeline_mode = #tpu.pipeline_mode<synchronous>, transform_indices = @transform_1, window_bounds = array<i64: 32, 2>}, {pipeline_mode = #tpu.pipeline_mode<synchronous>, transform_indices = @transform_2, window_bounds = array<i64: 32, 1>}, {pipeline_mode = #tpu.pipeline_mode<synchronous>, transform_indices = @transform_3, window_bounds = array<i64: 32, 32>}, {pipeline_mode = #tpu.pipeline_mode<synchronous>, transform_indices = @transform_4, window_bounds = array<i64: 32, 1>}, {pipeline_mode = #tpu.pipeline_mode<synchronous>, transform_indices = @transform_5, window_bounds = array<i64: 32, 1>}, {pipeline_mode = #tpu.pipeline_mode<synchronous>, transform_indices = @transform_6, window_bounds = array<i64: 1, 1>}, {transform_indices = @transform_7, window_bounds = array<i64: 1, 256>}]} {
    %c0 = arith.constant 0 : index
    %c0_0 = arith.constant 0 : index
    %0 = vector.load %arg1[%c0, %c0_0] : memref<2x256xf32, #tpu.memory_space<vmem>>, vector<2x256xf32>
    %1 = vector.extract_strided_slice %0 {offsets = [0, 0], sizes = [1, 256], strides = [1, 1]} : vector<2x256xf32> to vector<1x256xf32>
    %2 = vector.extract_strided_slice %0 {offsets = [1, 0], sizes = [1, 256], strides = [1, 1]} : vector<2x256xf32> to vector<1x256xf32>
    %c0_1 = arith.constant 0 : index
    %c0_2 = arith.constant 0 : index
    %3 = vector.load %arg2[%c0_1, %c0_2] : memref<32x2xf32, #tpu.memory_space<vmem>>, vector<32x2xf32>
    %4 = vector.extract_strided_slice %3 {offsets = [0, 0], sizes = [32, 1], strides = [1, 1]} : vector<32x2xf32> to vector<32x1xf32>
    %5 = vector.extract_strided_slice %3 {offsets = [0, 1], sizes = [32, 1], strides = [1, 1]} : vector<32x2xf32> to vector<32x1xf32>
    %6 = vector.broadcast %4 : vector<32x1xf32> to vector<32x256xf32>
    %7 = vector.broadcast %1 : vector<1x256xf32> to vector<32x256xf32>
    %8 = arith.mulf %6, %7 : vector<32x256xf32>
    %9 = vector.broadcast %5 : vector<32x1xf32> to vector<32x256xf32>
    %10 = vector.broadcast %2 : vector<1x256xf32> to vector<32x256xf32>
    %11 = arith.mulf %9, %10 : vector<32x256xf32>
    %12 = arith.addf %8, %11 : vector<32x256xf32>
    %c0_3 = arith.constant 0 : index
    %c0_4 = arith.constant 0 : index
    %13 = vector.load %arg3[%c0_3, %c0_4] : memref<32x1xf32, #tpu.memory_space<vmem>>, vector<32x1xf32>
    %14 = vector.broadcast %13 : vector<32x1xf32> to vector<32x256xf32>
    %15 = arith.addf %12, %14 : vector<32x256xf32>
    %16 = math.tanh %15 : vector<32x256xf32>
    %c0_5 = arith.constant 0 : index
    %c0_6 = arith.constant 0 : index
    %17 = vector.load %arg4[%c0_5, %c0_6] : memref<32x32xf32, #tpu.memory_space<vmem>>, vector<32x32xf32>
    %cst = arith.constant dense<0.000000e+00> : vector<32x256xf32>
    %18 = tpu.matmul %17, %16, %cst {dimension_numbers = #tpu.dot_dimension_numbers<[1], [0], [0], [1], [0, 0, 1, 1], [], []>} : vector<32x32xf32>, vector<32x256xf32>, vector<32x256xf32> -> vector<32x256xf32>
    %c0_7 = arith.constant 0 : index
    %c0_8 = arith.constant 0 : index
    %19 = vector.load %arg5[%c0_7, %c0_8] : memref<32x1xf32, #tpu.memory_space<vmem>>, vector<32x1xf32>
    %20 = vector.broadcast %19 : vector<32x1xf32> to vector<32x256xf32>
    %21 = arith.addf %18, %20 : vector<32x256xf32>
    %22 = math.tanh %21 : vector<32x256xf32>
    %c0_9 = arith.constant 0 : index
    %c0_10 = arith.constant 0 : index
    %23 = vector.load %arg6[%c0_9, %c0_10] : memref<32x1xf32, #tpu.memory_space<vmem>>, vector<32x1xf32>
    %24 = vector.broadcast %23 : vector<32x1xf32> to vector<32x256xf32>
    %25 = arith.mulf %24, %22 : vector<32x256xf32>
    %cst_11 = arith.constant dense<0.000000e+00> : vector<256xf32>
    %26 = vector.multi_reduction <add>, %25, %cst_11 [0] : vector<32x256xf32> to vector<256xf32>
    %27 = vector.shape_cast %26 : vector<256xf32> to vector<1x256xf32>
    %c0_12 = arith.constant 0 : index
    %c0_13 = arith.constant 0 : index
    %28 = vector.load %arg7[%c0_12, %c0_13] : memref<1x1xf32, #tpu.memory_space<vmem>>, vector<1x1xf32>
    %29 = vector.broadcast %28 : vector<1x1xf32> to vector<1x256xf32>
    %30 = arith.addf %27, %29 : vector<1x256xf32>
    %31 = arith.negf %30 : vector<1x256xf32>
    %32 = math.exp %31 : vector<1x256xf32>
    %cst_14 = arith.constant 1.000000e+00 : f32
    %33 = vector.broadcast %cst_14 : f32 to vector<1x256xf32>
    %34 = arith.addf %33, %32 : vector<1x256xf32>
    %35 = arith.divf %33, %34 : vector<1x256xf32>
    %c0_15 = arith.constant 0 : index
    %c0_16 = arith.constant 0 : index
    %36 = vector.load %arg8[%c0_15, %c0_16] : memref<1x256xf32, #tpu.memory_space<vmem>>, vector<1x256xf32>
    tpu.vector_store %arg8[%c0_15, %c0_16], %35 {strides = array<i32>} : memref<1x256xf32, #tpu.memory_space<vmem>>, vector<1x256xf32>,
    return
  }
  func.func @transform_0(%arg0: i32) -> (i32, i32) {
    %c0_i32 = arith.constant 0 : i32
    %c0_i32_0 = arith.constant 0 : i32
    return %c0_i32, %arg0 : i32, i32
  }
  func.func @transform_1(%arg0: i32) -> (i32, i32) {
    %c0_i32 = arith.constant 0 : i32
    %c0_i32_0 = arith.constant 0 : i32
    %c0_i32_1 = arith.constant 0 : i32
    return %c0_i32, %c0_i32_0 : i32, i32
  }
  func.func @transform_2(%arg0: i32) -> (i32, i32) {
    %c0_i32 = arith.constant 0 : i32
    %c0_i32_0 = arith.constant 0 : i32
    %c0_i32_1 = arith.constant 0 : i32
    return %c0_i32, %c0_i32_0 : i32, i32
  }
  func.func @transform_3(%arg0: i32) -> (i32, i32) {
    %c0_i32 = arith.constant 0 : i32
    %c0_i32_0 = arith.constant 0 : i32
    %c0_i32_1 = arith.constant 0 : i32
    return %c0_i32, %c0_i32_0 : i32, i32
  }
  func.func @transform_4(%arg0: i32) -> (i32, i32) {
    %c0_i32 = arith.constant 0 : i32
    %c0_i32_0 = arith.constant 0 : i32
    %c0_i32_1 = arith.constant 0 : i32
    return %c0_i32, %c0_i32_0 : i32, i32
  }
  func.func @transform_5(%arg0: i32) -> (i32, i32) {
    %c0_i32 = arith.constant 0 : i32
    %c0_i32_0 = arith.constant 0 : i32
    %c0_i32_1 = arith.constant 0 : i32
    return %c0_i32, %c0_i32_0 : i32, i32
  }
  func.func @transform_6(%arg0: i32) -> (i32, i32) {
    %c0_i32 = arith.constant 0 : i32
    %c0_i32_0 = arith.constant 0 : i32
    %c0_i32_1 = arith.constant 0 : i32
    return %c0_i32, %c0_i32_0 : i32, i32
  }
  func.func @transform_7(%arg0: i32) -> (i32, i32) {
    %c0_i32 = arith.constant 0 : i32
    %c0_i32_0 = arith.constant 0 : i32
    return %c0_i32, %arg0 : i32, i32
  }
}

</mosaic_0001>

<bundles_post_ra>
// kernel: tpu_custom_call.1
= control target key start
LH: loop header
LB: loop body
LE: loop exit
PB: predicated region body
PF: predicated region fallthrough
CT: control target
= control target key end

     0   :  { %s600_s0 = inlined_call_operand.vmem [shape: f32[2,256], index: 0, kind: input, shape index: {}]   ;;  %s601_s1 = inlined_call_operand.vmem [shape: f32[32,2], index: 1, kind: input, shape index: {}]   ;;  %s602_s2 = inlined_call_operand.vmem [shape: f32[32,1], index: 2, kind: input, shape index: {}]   ;;  %s603_s3 = inlined_call_operand.vmem [shape: f32[32,32], index: 3, kind: input, shape index: {}]   ;;  %s604_s4 = inlined_call_operand.vmem [shape: f32[32,1], index: 4, kind: input, shape index: {}]   ;;  %s605_s5 = inlined_call_operand.vmem [shape: f32[32,1], index: 5, kind: input, shape index: {}]   ;;  %s606_s6 = inlined_call_operand.<no memory space> [shape: f32[1,1], index: 6, kind: input, shape index: {}]   ;;  %s607_s7 = inlined_call_operand.hbm [shape: f32[1,256], index: 7, kind: output, shape index: {}]  }
   0x1   :  { %v12_v0 = vstv %s606_s6 }
   0x2   :  { %13 = vst [vmem:[#allocation2] sm:$0x1] %v12_v0 }
   0x3   :  { %v33_v1 = vld [vmem:[%s601_s1 + $0x18] sm:$0xff]  ;;  %v32_v2 = vld [vmem:[%s601_s1 + $0x10] sm:$0xff]  ;;  %v31_v3 = vld [vmem:[%s601_s1 + $0x8] sm:$0xff]  ;;  %v474_v4 = vmov 0  }
   0x4   :  { %403 = vset.pattern.permute.xlu2 %v474_v4  ;;  %401 = vset.pattern.permute.xlu1 %v474_v4 }
   0x5   :  { %399 = vset.pattern.permute.xlu0 %v474_v4  ;;  %46 = vperm.xlu1 %401, %v32_v2  }
   0x6   :  { %51 = vperm.xlu0 %399, %v33_v1   ;;  %41 = vperm.xlu2 %403, %v31_v3  }
   0x7   :  { %14 = vsyncpa [#allocation4], 0  ;;  %v475_v5 = vmov 1   ;;  %v30_v6 = vld [vmem:[%s601_s1] sm:$0xff]  ;;  %v110_v7 = vld [vmem:[%s602_s2 + $0x18] sm:$0xff]  ;;  %vm175_vm0 = vcmask 261120  }
   0x8   :  { %v109_v8 = vld [vmem:[%s602_s2 + $0x10] sm:$0xff]  ;;  %v107_v9 = vld [vmem:[%s602_s2] sm:$0xff]  ;;  %v108_v10 = vld [vmem:[%s602_s2 + $0x8] sm:$0xff]  ;;  %s369_s1 = sshll.u32 %s607_s7, 4  ;;  %vm354_vm8 = vcmask 1040384   ;;  %s370_s1 = int_to_ptr.hbm [resolvable:$true] %s369_s1 }
   0x9   :  { %v151_v11 = vld [vmem:[%s604_s4] sm:$0xff]  ;;  %v152_v13 = vld [vmem:[%s604_s4 + $0x8] sm:$0xff]  ;;  %v153_v14 = vld [vmem:[%s604_s4 + $0x10] sm:$0xff] }
   0xa   :  { %v254_v12 = vld [vmem:[%s605_s5] sm:$0xff]  ;;  %v257_v15 = vld [vmem:[%s605_s5 + $0x18] sm:$0xff]  ;;  %v255_v17 = vld [vmem:[%s605_s5 + $0x8] sm:$0xff] }
   0xb   :  { %v154_v16 = vld [vmem:[%s604_s4 + $0x18] sm:$0xff]  ;;  %v256_v18 = vld [vmem:[%s605_s5 + $0x10] sm:$0xff]  ;;  %v304_v19 = vld [vmem:[#allocation2] sm:$0x1] }
   0xc   :  { %v29_v24 = vld [vmem:[%s600_s0] sm:$0xf] }
   0xd   :  { %402 = vset.pattern.permute.xlu1 %v475_v5  ;;  %v85_v25 = vperm.slane %v29_v24, 1  ;;  %v86_v26 = vperm.slane %v29_v24, 3  ;;  %v55_v27 = vperm.slane %v29_v24, 0  ;;  %v56_v28 = vperm.slane %v29_v24, 2 }
   0xe   :  { %400 = vset.pattern.permute.xlu0 %v475_v5  ;;  %404 = vset.pattern.permute.xlu2 %v475_v5 }
   0xf   :  { %82 = vperm.xlu0 %400, %v33_v1   ;;  %78 = vperm.xlu1 %402, %v32_v2   ;;  %v89_v31 = vperm.slane %v85_v25, 1  ;;  %v90_v32 = vperm.slane %v86_v26, 1  ;;  %v59_v33 = vperm.slane %v55_v27, 0  ;;  %v60_v34 = vperm.slane %v56_v28, 0 }
  0x10   :  { %74 = vperm.xlu2 %404, %v31_v3  }
  0x17   :  { %405 = vset.pattern.permute.xlu1 %v474_v4  ;;  %70 = vperm.xlu0 %400, %v30_v6  }
  0x18   :  { %406 = vset.pattern.permute.xlu2 %v474_v4  ;;  %128 = vperm.xlu1 %405, %v110_v7  }
  0x19   :  { %36 = vperm.xlu2 %406, %v30_v6  }
  0x1f   :  { %407 = vset.pattern.permute.xlu0 %v474_v4 }
  0x20   :  { %123 = vperm.xlu1 %405, %v109_v8   ;;  %113 = vperm.xlu0 %407, %v107_v9  }
  0x21   :  { %118 = vperm.xlu2 %406, %v108_v10  }
  0x28   :  { %157 = vperm.xlu1 %405, %v151_v11   ;;  %260 = vperm.xlu0 %407, %v254_v12  }
  0x29   :  { %162 = vperm.xlu2 %406, %v152_v13  }
  0x30   :  { %167 = vperm.xlu1 %405, %v153_v14   ;;  %275 = vperm.xlu0 %407, %v257_v15  }
  0x31   :  { %172 = vperm.xlu2 %406, %v154_v16   ;;  %v147_v16 = vld [vmem:[%s603_s3] sm:$0xff] }
  0x38   :  { %265 = vperm.xlu1 %405, %v255_v17   ;;  %v149_v17 = vld [vmem:[%s603_s3 + $0x10] sm:$0xff] }
  0x39   :  { %270 = vperm.xlu2 %406, %v256_v18  }
  0x40   :  { %307 = vperm.xlu1 %405, %v304_v19   ;;  %v148_v19 = vld [vmem:[%s603_s3 + $0x8] sm:$0xff] }
  0x60   :  { %v42_v20 = vpop.permute.xlu2 %41 }
  0x61   :  { %v63_v43 = vmul.f32 %v59_v33, %v42_v20  ;;  %v64_v48 = vmul.f32 %v60_v34, %v42_v20  ;;  %v150_v20 = vld [vmem:[%s603_s3 + $0x18] sm:$0xff]  ;;  %s476_s3 = smov [#allocation3]  }
  0x62   :  { %s367_s15 = sshll.u32 %s476_s3, 4  ;;  %s368_s15 = int_to_ptr.vmem [resolvable:$true] %s367_s15 }
  0x6a   :  { %v75_v23 = vpop.permute.xlu2 %74 }
  0x6b   :  { %v93_v44 = vmul.f32 %v89_v31, %v75_v23  ;;  %v94_v49 = vmul.f32 %v90_v32, %v75_v23 }
  0x6d   :  { %v101_v52 = vadd.f32 %v93_v44, %v63_v43  ;;  %v102_v58 = vadd.f32 %v94_v49, %v64_v48 }
  0x73   :  { %v37_v37 = vpop.permute.xlu2 %36 }
  0x74   :  { %v61_v53 = vmul.f32 %v59_v33, %v37_v37  ;;  %v62_v57 = vmul.f32 %v60_v34, %v37_v37 }
  0x77   :  { %v47_v21 = vpop.permute.xlu1 %46 }
  0x78   :  { %v52_v22 = vpop.permute.xlu0 %51  ;;  %v65_v54 = vmul.f32 %v59_v33, %v47_v21  ;;  %v66_v55 = vmul.f32 %v60_v34, %v47_v21 }
  0x79   :  { %v67_v38 = vmul.f32 %v59_v33, %v52_v22  ;;  %v68_v39 = vmul.f32 %v60_v34, %v52_v22 }
  0x7b   :  { %v119_v60 = vpop.permute.xlu2 %118 }
  0x7c   :  { %v133_v2 = vadd.f32 %v119_v60, %v101_v52  ;;  %v134_v7 = vadd.f32 %v119_v60, %v102_v58 }
  0x81   :  { %v83_v29 = vpop.permute.xlu0 %82  ;;  %v79_v30 = vpop.permute.xlu1 %78 }
  0x82   :  { %v97_v35 = vmul.f32 %v89_v31, %v83_v29  ;;  %v98_v36 = vmul.f32 %v90_v32, %v83_v29  ;;  %v95_v50 = vmul.f32 %v89_v31, %v79_v30  ;;  %v96_v51 = vmul.f32 %v90_v32, %v79_v30 }
  0x83   :  { %v163_v23 = vpop.permute.xlu2 %162 }
  0x84   :  { %v105_v41 = vadd.f32 %v97_v35, %v67_v38  ;;  %v106_v42 = vadd.f32 %v98_v36, %v68_v39  ;;  %v103_v61 = vadd.f32 %v95_v50, %v65_v54  ;;  %v104_v62 = vadd.f32 %v96_v51, %v66_v55 }
  0x89   :  { %v71_v40 = vpop.permute.xlu0 %70 }
  0x8a   :  { %v129_v45 = vpop.permute.xlu1 %128  ;;  %v91_v56 = vmul.f32 %v89_v31, %v71_v40  ;;  %v92_v59 = vmul.f32 %v90_v32, %v71_v40 }
  0x8b   :  { %v137_v46 = vadd.f32 %v129_v45, %v105_v41  ;;  %v138_v47 = vadd.f32 %v129_v45, %v106_v42  ;;  %v173_v36 = vpop.permute.xlu2 %172 }
  0x8c   :  { %v99_v5 = vadd.f32 %v91_v56, %v61_v53  ;;  %v100_v8 = vadd.f32 %v92_v59, %v62_v57 }
  0x8d   :  { %408 = vtanh.f32 %v137_v46 }
  0x8e   :  { %410 = vtanh.f32 %v138_v47 }
  0x92   :  { %v124_v63 = vpop.permute.xlu1 %123  ;;  %v114_v0 = vpop.permute.xlu0 %113 }
  0x93   :  { %v409_v1 = vpop.eup %408  ;;  %v135_v3 = vadd.f32 %v124_v63, %v103_v61  ;;  %v136_v4 = vadd.f32 %v124_v63, %v104_v62  ;;  %v131_v9 = vadd.f32 %v114_v0, %v99_v5  ;;  %v132_v10 = vadd.f32 %v114_v0, %v100_v8  ;;  %v271_v54 = vpop.permute.xlu2 %270 }
  0x94   :  { %v411_v6 = vpop.eup %410  ;;  %200 = vmatpush.msra.mxu0 %v409_v1  ;;  %388 = vmatpush.msra.mxu2 %v409_v1 }
  0x95   :  { %412 = vtanh.f32 %v135_v3  ;;  %229 = vmatpush.msra.mxu1 %v411_v6  ;;  %392 = vmatpush.msra.mxu3 %v411_v6 }
  0x96   :  { %414 = vtanh.f32 %v136_v4 }
  0x97   :  { %416 = vtanh.f32 %v133_v2 }
  0x98   :  { %418 = vtanh.f32 %v134_v7 }
  0x99   :  { %420 = vtanh.f32 %v131_v9 }
  0x9a   :  { %422 = vtanh.f32 %v132_v10  ;;  %v158_v21 = vpop.permute.xlu1 %157  ;;  %v261_v37 = vpop.permute.xlu0 %260 }
  0x9b   :  { %v413_v11 = vpop.eup %412 }
  0x9c   :  { %v415_v12 = vpop.eup %414  ;;  %201 = vmatpush.msra.mxu0 %v413_v11  ;;  %389 = vmatpush.msra.mxu2 %v413_v11 }
  0x9d   :  { %v417_v13 = vpop.eup %416  ;;  %230 = vmatpush.msra.mxu1 %v415_v12  ;;  %393 = vmatpush.msra.mxu3 %v415_v12 }
  0x9e   :  { %v419_v14 = vpop.eup %418  ;;  %202 = vmatpush.msra.mxu0 %v417_v13  ;;  %390 = vmatpush.msra.mxu2 %v417_v13 }
  0x9f   :  { %v421_v15 = vpop.eup %420  ;;  %231 = vmatpush.msra.mxu1 %v419_v14  ;;  %394 = vmatpush.msra.mxu3 %v419_v14 }
  0xa0   :  { %v423_v18 = vpop.eup %422  ;;  %203 = vmatpush.msra.mxu0 %v421_v15  ;;  %391 = vmatpush.msra.mxu2 %v421_v15 }
  0xa1   :  { %232 = vmatpush.msra.mxu1 %v423_v18  ;;  %395 = vmatpush.msra.mxu3 %v423_v18 }
  0xa2   :  { %378 = vmatmul.msk.f32.vlgmr.msra.gmra.mxu0 %vm175_vm0, %v147_v16  ;;  %380 = vmatmul.msk.f32.vlgmr.msra.gmra.mxu2 %vm175_vm0, %v149_v17  ;;  %v168_v28 = vpop.permute.xlu1 %167  ;;  %v276_v58 = vpop.permute.xlu0 %275 }
  0xa3   :  { %382 = vmatmul.msk.f32.vlgmr.msra.gmra.mxu1 %vm175_vm0, %v147_v16  ;;  %384 = vmatmul.msk.f32.vlgmr.msra.gmra.mxu3 %vm175_vm0, %v149_v17 }
  0xaa   :  { %379 = vmatmul.msk.f32.gmra.mxu0 %vm175_vm0, %v148_v19  ;;  %381 = vmatmul.msk.f32.gmra.mxu2 %vm175_vm0, %v150_v20  ;;  %v266_v45 = vpop.permute.xlu1 %265 }
  0xab   :  { %383 = vmatmul.msk.f32.gmra.mxu1 %vm175_vm0, %v148_v19  ;;  %385 = vmatmul.msk.f32.gmra.mxu3 %vm175_vm0, %v150_v20 }
  0xb2   :  { %v308_v10 = vpop.permute.xlu1 %307 }
  0xb3   :  { %v310_v14 = vperm.slane %v308_v10, 0 }
 0x11f   :  { %v205_v22 = vpop.f32.mrf.mxu0 }
 0x120   :  { %v234_v24 = vpop.f32.mrf.mxu1  ;;  %v206_v25 = vadd.f32 %v205_v22, %v158_v21 }
 0x121   :  { %v235_v26 = vadd.f32 %v234_v24, %v158_v21 }
 0x122   :  { %424 = vtanh.f32 %v206_v25 }
 0x123   :  { %426 = vtanh.f32 %v235_v26 }
 0x125   :  { %v211_v27 = vpop.f32.mrf.mxu2 }
 0x126   :  { %v240_v29 = vpop.f32.mrf.mxu3  ;;  %v212_v31 = vadd.f32 %v211_v27, %v168_v28 }
 0x127   :  { %v208_v30 = vpop.f32.mrf.mxu0  ;;  %v241_v34 = vadd.f32 %v240_v29, %v168_v28 }
 0x128   :  { %v209_v32 = vadd.f32 %v208_v30, %v163_v23  ;;  %v237_v33 = vpop.f32.mrf.mxu1  ;;  %v425_v39 = vpop.eup %424 }
 0x129   :  { %v238_v35 = vadd.f32 %v237_v33, %v163_v23  ;;  %v427_v42 = vpop.eup %426  ;;  %v278_v47 = vmul.f32 %v425_v39, %v261_v37 }
 0x12a   :  { %428 = vtanh.f32 %v209_v32  ;;  %v279_v50 = vmul.f32 %v427_v42, %v261_v37 }
 0x12b   :  { %430 = vtanh.f32 %v238_v35 }
 0x12c   :  { %432 = vtanh.f32 %v212_v31 }
 0x12d   :  { %434 = vtanh.f32 %v241_v34  ;;  %v214_v38 = vpop.f32.mrf.mxu2 }
 0x12e   :  { %v215_v40 = vadd.f32 %v214_v38, %v173_v36  ;;  %v243_v41 = vpop.f32.mrf.mxu3 }
 0x12f   :  { %v244_v43 = vadd.f32 %v243_v41, %v173_v36 }
 0x130   :  { %v429_v44 = vpop.eup %428  ;;  %436 = vtanh.f32 %v215_v40  ;;  %v357_v40 = vlaneseq }
 0x131   :  { %v431_v46 = vpop.eup %430  ;;  %v280_v48 = vmul.f32 %v429_v44, %v266_v45  ;;  %438 = vtanh.f32 %v244_v43 }
 0x132   :  { %v433_v49 = vpop.eup %432  ;;  %v281_v51 = vmul.f32 %v431_v46, %v266_v45  ;;  %vm359_vm10 = vcmp.lt.s32.totalorder %v357_v40, 256 }
 0x133   :  { %v435_v52 = vpop.eup %434  ;;  %v286_v53 = vadd.f32 %v280_v48, %v278_v47  ;;  %v282_v56 = vmul.f32 %v433_v49, %v271_v54 }
 0x134   :  { %v295_v55 = vadd.f32 %v281_v51, %v279_v50  ;;  %v283_v59 = vmul.f32 %v435_v52, %v271_v54 }
 0x135   :  { %v287_v62 = vadd.f32 %v286_v53, %v282_v56 }
 0x136   :  { %v437_v57 = vpop.eup %436  ;;  %v296_v0 = vadd.f32 %v295_v55, %v283_v59 }
 0x137   :  { %v439_v60 = vpop.eup %438  ;;  %v284_v61 = vmul.f32 %v437_v57, %v276_v58 }
 0x138   :  { %v285_v63 = vmul.f32 %v439_v60, %v276_v58 }
 0x139   :  { %v288_v1 = vadd.f32 %v287_v62, %v284_v61 }
 0x13a   :  { %v297_v2 = vadd.f32 %v296_v0, %v285_v63 }
 0x13b   :  { %v289_v3 = vrot.slane %v288_v1, 4 }
 0x13c   :  { %v298_v4 = vrot.slane %v297_v2, 4 }
 0x13d   :  { %v290_v5 = vadd.f32 %v289_v3, %v288_v1 }
 0x13e   :  { %v299_v6 = vadd.f32 %v298_v4, %v297_v2 }
 0x13f   :  { %v291_v7 = vrot.slane %v290_v5, 2 }
 0x140   :  { %v300_v8 = vrot.slane %v299_v6, 2 }
 0x141   :  { %v292_v9 = vadd.f32 %v291_v7, %v290_v5 }
 0x142   :  { %v301_v11 = vadd.f32 %v300_v8, %v299_v6 }
 0x143   :  { %v293_v12 = vrot.slane %v292_v9, 1 }
 0x144   :  { %v302_v13 = vrot.slane %v301_v11, 1 }
 0x145   :  { %v294_v15 = vadd.f32 %v293_v12, %v292_v9 }
 0x146   :  { %v303_v16 = vadd.f32 %v302_v13, %v301_v11 }
 0x147   :  { %v311_v17 = vadd.f32 %v310_v14, %v294_v15 }
 0x148   :  { %v312_v18 = vadd.f32 %v310_v14, %v303_v16 }
 0x149   :  { %v386_v19 = vmul.f32 -1.442695, %v311_v17 }
 0x14a   :  { %v387_v20 = vmul.f32 -1.442695, %v312_v18 }
 0x14b   :  { %440 = vpow2.f32 %v386_v19 }
 0x14c   :  { %442 = vpow2.f32 %v387_v20 }
 0x151   :  { %v441_v21 = vpop.eup %440 }
 0x152   :  { %v443_v22 = vpop.eup %442  ;;  %v319_v23 = vadd.f32 1.0, %v441_v21 }
 0x153   :  { %v320_v24 = vadd.f32 1.0, %v443_v22 }
 0x154   :  { %444 = vrcp.f32 %v319_v23  ;;  %vm326_vm3 = vweird.f32 %v319_v23  ;;  %v332_v36 = vand.u32 2147483648, %v319_v23  ;;  %v330_v38 = vand.u32 2147483647, %v319_v23 }
 0x155   :  { %446 = vrcp.f32 %v320_v24  ;;  %v347_v32 = vand.u32 2147483648, %v320_v24  ;;  %v345_v34 = vand.u32 2147483647, %v320_v24  ;;  %vm341_vm5 = vweird.f32 %v320_v24 }
 0x156   :  { %v333_v44 = vor.u32 1.1754944e-38, %v332_v36  ;;  %vm331_vm9 = vcmp.eq.f32.partialorder %v330_v38, 8.507059e+37 }
 0x157   :  { %v348_v41 = vor.u32 1.1754944e-38, %v347_v32  ;;  %vm346_vm7 = vcmp.eq.f32.partialorder %v345_v34, 8.507059e+37 }
 0x15a   :  { %v445_v25 = vpop.eup %444 }
 0x15b   :  { %v447_v26 = vpop.eup %446  ;;  %v322_v27 = vmul.f32 %v445_v25, %v319_v23  ;;  %vm327_vm1 = vweird.f32 %v445_v25 }
 0x15c   :  { %v337_v28 = vmul.f32 %v447_v26, %v320_v24  ;;  %vm342_vm2 = vweird.f32 %v447_v26  ;;  %vm591_vm4 = vmor %vm326_vm3, %vm327_vm1 }
 0x15d   :  { %v323_v29 = vsub.f32 1.0, %v322_v27  ;;  %vm343_vm6 = vmor %vm341_vm5, %vm342_vm2 }
 0x15e   :  { %v338_v30 = vsub.f32 1.0, %v337_v28 }
 0x15f   :  { %v324_v31 = vmul.f32 %v445_v25, %v323_v29 }
 0x160   :  { %v339_v33 = vmul.f32 %v447_v26, %v338_v30 }
 0x161   :  { %v325_v35 = vadd.f32 %v445_v25, %v324_v31 }
 0x162   :  { %v340_v39 = vadd.f32 %v447_v26, %v339_v33 }
 0x163   :  { %v329_v42 = vsel %vm591_vm4, %v445_v25, %v325_v35 }
 0x164   :  { %v344_v43 = vsel %vm343_vm6, %v447_v26, %v340_v39  ;;  %v334_v47 = vsel %vm331_vm9, %v333_v44, %v329_v42 }
 0x165   :  { %v349_v45 = vsel %vm346_vm7, %v348_v41, %v344_v43 }
 0x166   :  { %v353_v46 = vrot.slane %v349_v45, 7 }
 0x168   :  { %v355_v48 = vsel %vm354_vm8, %v334_v47, %v353_v46 }
 0x169   :  { %361 = vst.msk [vmem:[#allocation3] sm:$0x3] %vm359_vm10, %v355_v48 }
 0x16a   :  { %372 = dma.vmem_to_hbm [thread:$0]  %s368_s15, 32, %s370_s1, [#allocation4]  }
 0x16b   :  { %472 = dma.done.wait [#allocation4], 32  }
 0x16c   :  { %473 = vsyncadd [#allocation4], 4294967264 }
 0x16d   :  { %377 = vsyncpa [#allocation4], 1 }

</bundles_post_ra>
